<compile_context>
chip_gen: v5e
topology: v5e:2x2
jax: 0.10.0
libtpu: 0.0.40
codegen_flags: <defaults>
</compile_context>

<pallas_src>
import functools

import numpy as np
import jax
import jax.numpy as jnp
from jax.experimental import pallas as pl
from jax.experimental.pallas import tpu as pltpu


def _round_up(a, b):
    return (a + b - 1) // b * b


def _choose_tk(K, Gc, epb, cap):
    """Pick a K-tile size that (a) divides K, (b) is lane aligned, and (c) either spans a
    whole number of quant groups with bit-plane alignment (tk % (epb*Gc) == 0) or is a whole
    divisor of one group (Gc % tk == 0)."""
    cands = []
    t = 128
    while t <= K:
        if K % t == 0 and (Gc % t == 0 or t % (epb * Gc) == 0):
            cands.append(t)
        t += 128
    if not cands and (Gc == K or K % (epb * Gc) == 0):
        cands.append(K)  # full-K tile (allowed even if K % 128 != 0)
    assert cands, "no compatible K tile for this (in_features, tile_cols, bits)"
    small = [t for t in cands if t <= cap]
    return max(small) if small else min(cands)


def _repack_for_tiles(quant_weight, bits, epb, tk):
    """One-time weight transform (cache it in real use: depends only on weights and tk).

    Original packing: byte c, bit-plane nr            -> input column c*epb + nr.
    New packing (per K tile of tk columns, tkb = tk//epb bytes):
        byte (kt*tkb + c), bit-plane nr               -> input column kt*tk + nr*tkb + c
    so each unpacked bit-plane corresponds to a contiguous run of activation columns.
    Returns the repacked weight transposed to (K//epb, N) for K-major tiling.
    """
    N, Kb = quant_weight.shape
    K = Kb * epb
    tkb = tk // epb
    nkt = K // tk
    mask = (1 << bits) - 1
    q = quant_weight.astype(jnp.int32)
    planes = [(q >> (nr * bits)) & mask for nr in range(epb)]      # each (N, Kb)
    codes = jnp.stack(planes, axis=-1).reshape(N, K)               # codes[:, c*epb + nr]
    codes = codes.reshape(N, nkt, epb, tkb)                        # [n, kt, nr, c]
    new_q = codes[:, :, 0, :]
    for nr in range(1, epb):
        new_q = new_q | (codes[:, :, nr, :] << (nr * bits))
    return new_q.reshape(N, Kb).astype(jnp.uint8).T                # (Kb, N)


def _qlinear_kernel(x_ref, qw_ref, sc_ref, zs_ref, b_ref, o_ref, acc_ref, *,
                    bits, segments, gpk, kpg, defer_scale, out_dtype):
    """One (tm, tn) output tile, accumulated over the K grid axis.

    x_ref  : (tm, tk)       activations, original column order
    qw_ref : (tk//epb, tn)  repacked uint8 weights (K-major, per-tile bit-plane layout)
    sc_ref : (G, 1, tn)     f32 scale       per (group, out col)  -- whole slab, j-resident
    zs_ref : (G, 1, tn)     f32 zero*scale  per (group, out col)  -- whole slab, j-resident
    b_ref  : (1, tn)        f32 bias
    o_ref  : (tm, tn)       output
    acc_ref: (tm, tn)       f32 scratch accumulator

    `segments` groups the K tile into chunks that share one (scale, zero); each chunk is a
    list of (shift, byte_row0, byte_rows, x_col0, x_cols) slices (trace-time constants).
    """
    k = pl.program_id(2)
    mask = (1 << bits) - 1

    @pl.when(k == 0)
    def _():
        acc_ref[...] = jnp.broadcast_to(b_ref[...], acc_ref.shape)

    for gi, segs in segments:
        # scale-group row of this chunk (groups-per-tile gpk, tiles-per-group kpg)
        row = k * gpk + gi if kpg == 1 else k // kpg
        sc = sc_ref[row]            # (1, tn)
        zs = zs_ref[row]            # (1, tn) == zero * scale

        if defer_scale:
            # Wide groups: keep exact integer codes on the MXU, apply scale/zero to the
            # (tm, tn) partial:  acc += (x @ codes) * scale - rowsum(x) * (zero*scale)
            part = None
            xs = None
            for shift, r0, rlen, c0, clen in segs:
                q = qw_ref[r0:r0 + rlen, :].astype(jnp.int32)
                codes = ((q >> shift) & mask) if shift else (q & mask)
                xseg = x_ref[:, c0:c0 + clen]
                p = jnp.dot(xseg.astype(jnp.bfloat16), codes.astype(jnp.bfloat16),
                            preferred_element_type=jnp.float32)
                part = p if part is None else part + p
                s = jnp.sum(xseg.astype(jnp.float32), axis=1, keepdims=True)
                xs = s if xs is None else xs + s
            acc_ref[...] += part * sc - xs * zs
        else:
            # Narrow groups: dequantize the (rows, tn) weight chunk and feed bf16 to the MXU.
            for shift, r0, rlen, c0, clen in segs:
                q = qw_ref[r0:r0 + rlen, :].astype(jnp.int32)
                codes = (((q >> shift) & mask) if shift else (q & mask)).astype(jnp.float32)
                w = (codes * sc - zs).astype(jnp.bfloat16)
                acc_ref[...] += jnp.dot(x_ref[:, c0:c0 + clen].astype(jnp.bfloat16), w,
                                        preferred_element_type=jnp.float32)

    @pl.when(k == pl.num_programs(2) - 1)
    def _():
        o_ref[...] = acc_ref[...].astype(out_dtype)


def col_block_quantized_linear(inp, quant_weight, scales, zeros, bias, *,
                               bits, tile_cols, max_tk=1024):
    """Forward pass of ColBlockQuantizedLinear: inp @ dequant(quant_weight).T + bias."""
    assert 8 % bits == 0
    epb = 8 // bits                        # entries per byte
    N, Kb = quant_weight.shape
    K = Kb * epb
    Gc = K if tile_cols == -1 else tile_cols
    G = (K + Gc - 1) // Gc
    assert scales.shape == (N, G) and zeros.shape == (N, G)
    assert inp.shape[-1] == K
    # TODO(synk): ragged trailing quant group (in_features % tile_cols != 0) not supported.
    assert K % Gc == 0

    out_dtype = inp.dtype
    lead = inp.shape[:-1]
    x2 = inp.reshape(-1, K)
    M = x2.shape[0]

    # ---- tiling ----------------------------------------------------------
    tk = _choose_tk(K, Gc, epb, max_tk)
    tkb = tk // epb
    nkt = K // tk
    case_a = (tk % (epb * Gc) == 0)        # K tile spans >=1 whole groups, plane-aligned
    if case_a:
        cpp = tkb // Gc                    # groups per bit-plane
        gpk, kpg = tk // Gc, 1             # groups per K tile / K tiles per group
        chunk_cols = Gc
        segments = tuple(
            (gi, (((gi // cpp) * bits, (gi % cpp) * Gc, Gc, gi * Gc, Gc),))
            for gi in range(gpk))
    else:                                  # K tile is a fraction of one group
        gpk, kpg = 1, Gc // tk
        chunk_cols = tk
        segments = ((0, tuple((nr * bits, 0, tkb, nr * tkb, tkb) for nr in range(epb))),)

    tn = 256 if N % 256 == 0 else (128 if N % 128 == 0 else N)
    tm = min(256, _round_up(M, 8))
    Mp = _round_up(M, tm)
    # v7x has 2 TensorCores: give the parallel (i, j) grid >= 2 programs when possible.
    if (Mp // tm) * (N // tn) < 2 and tn > 128 and (tn // 2) % 128 == 0:
        tn //= 2
    # Defer scale/zero past the quantized matmul when groups are wide relative to the M tile
    # (exact bf16 weight operand, ~chunk/tm fewer VPU ops); otherwise dequantize in-kernel.
    defer_scale = chunk_cols >= 2 * tm

    # ---- layout plumbing (weights: one-time transform; activations: reshape/pad only) ----
    qw_t = _repack_for_tiles(quant_weight, bits, epb, tk)          # (Kb, N) uint8
    scales_f = jnp.asarray(scales, jnp.float32)
    scales_t = scales_f.T.reshape(G, 1, N)                         # (G, 1, N)
    zscale_t = (jnp.asarray(zeros, jnp.float32) * scales_f).T.reshape(G, 1, N)
    if bias is None:
        b2 = jnp.zeros((1, N), jnp.float32)
    else:
        b2 = jnp.asarray(bias, jnp.float32).reshape(1, N)
    if Mp != M:
        x2 = jnp.pad(x2, ((0, Mp - M), (0, 0)))

    kernel = functools.partial(_qlinear_kernel, bits=bits, segments=segments,
                               gpk=gpk, kpg=kpg, defer_scale=defer_scale,
                               out_dtype=out_dtype)

    # VMEM footprint (double-buffered) at the largest tiles (tm=256, tn=256, tk=1024, f32 x):
    # ~2*(1 MiB x + 128 KiB qw + 256 KiB out) + 256 KiB acc + small scale slabs  ~= 3 MiB,
    # comfortably inside the default scoped-VMEM limit on v5e/v6e and v7x (64 MiB physical).
    out = pl.pallas_call(
        kernel,
        out_shape=jax.ShapeDtypeStruct((Mp, N), out_dtype),
        grid_spec=pltpu.PrefetchScalarGridSpec(
            num_scalar_prefetch=0,
            grid=(Mp // tm, N // tn, nkt),
            in_specs=[
                pl.BlockSpec((tm, tk), lambda i, j, k: (i, k)),          # activations
                pl.BlockSpec((tkb, tn), lambda i, j, k: (k, j)),         # packed weights
                pl.BlockSpec((G, 1, tn), lambda i, j, k: (0, 0, j)),     # scales (j-resident)
                pl.BlockSpec((G, 1, tn), lambda i, j, k: (0, 0, j)),     # zero*scale (j-resident)
                pl.BlockSpec((1, tn), lambda i, j, k: (0, j)),           # bias (j-resident)
            ],
            out_specs=pl.BlockSpec((tm, tn), lambda i, j, k: (i, j)),
            scratch_shapes=[pltpu.VMEM((tm, tn), jnp.float32)],
        ),
        compiler_params=pltpu.CompilerParams(
            dimension_semantics=("parallel", "parallel", "arbitrary")),
    )(x2, qw_t, scales_t, zscale_t, b2)

    return out[:M].reshape(lead + (N,))


def _reference_forward(inp, quant_weight, scales, zeros, bias, *, bits, tile_cols):
    """Pure-JAX (f32) reproduction of ColBlockQuantizedLinear.get_weight + F.linear."""
    epb = 8 // bits
    N, Kb = quant_weight.shape
    K = Kb * epb
    if tile_cols == -1:
        tile_cols = K
    mask = (1 << bits) - 1
    q = quant_weight.astype(jnp.int32)
    w = jnp.zeros((N, K), jnp.float32)
    for nr in range(epb):
        w = w.at[:, nr::epb].set(((q >> (nr * bits)) & mask).astype(jnp.float32))
    G = scales.shape[1]
    for g in range(G):
        sl = slice(g * tile_cols, (g + 1) * tile_cols)
        w = w.at[:, sl].add(-zeros[:, g:g + 1])
        w = w.at[:, sl].multiply(scales[:, g:g + 1])
    out = jnp.einsum("...k,nk->...n", inp.astype(jnp.float32), w)
    if bias is not None:
        out = out + bias
    return out.astype(inp.dtype)


if __name__ == "__main__":
    configs = [
        # (name, leading shape, in_features, out_features, bias, bits, tile_cols, max_tk)
        ("4bit_g128_decode", (2, 8), 256, 128, True, 4, 128, 1024),   # deferral path
        ("4bit_g128_prefill", (512,), 1024, 256, True, 4, 128, 512),  # dequant path, multi-k grid
        ("4bit_whole_column", (2, 8), 256, 128, False, 4, -1, 1024),  # G=1 (Triton-path config)
        ("8bit_group64", (16,), 256, 128, True, 8, 64, 1024),         # 8-bit, small groups
    ]

    key = jax.random.PRNGKey(0)
    for name, lead, in_f, out_f, use_bias, bits, tile_cols, max_tk in configs:
        key, k1, k2, k3, k4, k5 = jax.random.split(key, 6)
        epb = 8 // bits
        Gc = in_f if tile_cols == -1 else tile_cols
        G = (in_f + Gc - 1) // Gc

        quant_weight = jax.random.randint(
            k1, (out_f, in_f // epb), 0, 256, dtype=jnp.int32).astype(jnp.uint8)
        scales = jax.random.uniform(k2, (out_f, G), jnp.float32, 0.01, 0.02)
        zeros = jax.random.uniform(k3, (out_f, G), jnp.float32, 0.0,
                                   float((1 << bits) - 1))
        bias = (0.1 * jax.random.normal(k4, (out_f,), jnp.float32)) if use_bias else None
        x = jax.random.normal(k5, lead + (in_f,), jnp.float32)

        out = col_block_quantized_linear(x, quant_weight, scales, zeros, bias,
                                         bits=bits, tile_cols=tile_cols, max_tk=max_tk)
        out = jax.block_until_ready(out)

        ref = np.asarray(_reference_forward(x, quant_weight, scales, zeros, bias,
                                            bits=bits, tile_cols=tile_cols))
        # bf16 MXU operands with f32 accumulation: tolerance scaled to output magnitude.
        atol = 4e-3 * float(np.max(np.abs(ref))) + 1e-6
        np.testing.assert_allclose(np.asarray(out), ref, rtol=2e-2, atol=atol,
                                   err_msg=f"mismatch for config {name}")

    print("KERNEL_OK")
</pallas_src>

<mosaic_0001>
module attributes {stable_mosaic.version = 11 : i64} {
  func.func @_qlinear_kernel(%arg0: i32, %arg1: i32, %arg2: i32, %arg3: memref<16x256xf32, #tpu.memory_space<vmem>>, %arg4: memref<128x128xi8, #tpu.memory_space<vmem>>, %arg5: memref<2x1x128xf32, #tpu.memory_space<vmem>>, %arg6: memref<2x1x128xf32, #tpu.memory_space<vmem>>, %arg7: memref<1x128xf32, #tpu.memory_space<vmem>>, %arg8: memref<16x128xf32, #tpu.memory_space<vmem>>, %arg9: memref<16x128xf32, #tpu.memory_space<vmem>>) attributes {dimension_semantics = [#tpu.dimension_semantics<parallel>, #tpu.dimension_semantics<parallel>, #tpu.dimension_semantics<arbitrary>], iteration_bounds = array<i64: 1, 1, 1>, scalar_prefetch = 0 : i64, scratch_operands = 1 : i64, tpu.core_type = #tpu.core_type<tc>, window_params = [{transform_indices = @transform_0, window_bounds = array<i64: 16, 256>}, {transform_indices = @transform_1, window_bounds = array<i64: 128, 128>}, {transform_indices = @transform_2, window_bounds = array<i64: 2, 1, 128>}, {transform_indices = @transform_3, window_bounds = array<i64: 2, 1, 128>}, {transform_indices = @transform_4, window_bounds = array<i64: 1, 128>}, {transform_indices = @transform_5, window_bounds = array<i64: 16, 128>}]} {
    %c0_i32 = arith.constant 0 : i32
    %0 = arith.cmpi eq, %arg2, %c0_i32 : i32
    %1 = arith.extui %0 : i1 to i32
    %c0_i32_0 = arith.constant 0 : i32
    %2 = arith.cmpi ne, %1, %c0_i32_0 : i32
    scf.if %2 {
      %c0_31 = arith.constant 0 : index
      %c0_32 = arith.constant 0 : index
      %62 = vector.load %arg7[%c0_31, %c0_32] : memref<1x128xf32, #tpu.memory_space<vmem>>, vector<1x128xf32>
      %63 = vector.shape_cast %62 : vector<1x128xf32> to vector<1x128xf32>
      %64 = vector.broadcast %63 : vector<1x128xf32> to vector<16x128xf32>
      %c0_33 = arith.constant 0 : index
      %c0_34 = arith.constant 0 : index
      %65 = vector.load %arg9[%c0_33, %c0_34] : memref<16x128xf32, #tpu.memory_space<vmem>>, vector<16x128xf32>
      tpu.vector_store %arg9[%c0_33, %c0_34], %64 {strides = array<i32>} : memref<16x128xf32, #tpu.memory_space<vmem>>, vector<16x128xf32>,
    } else {
    }
    %c2_i32 = arith.constant 2 : i32
    %3 = arith.muli %arg2, %c2_i32 : i32
    %c0_i32_1 = arith.constant 0 : i32
    %4 = arith.addi %3, %c0_i32_1 : i32
    %5 = arith.index_cast %4 : i32 to index
    %c0 = arith.constant 0 : index
    %c0_2 = arith.constant 0 : index
    %6 = vector.load %arg5[%5, %c0, %c0_2] : memref<2x1x128xf32, #tpu.memory_space<vmem>>, vector<1x1x128xf32>
    %7 = vector.shape_cast %6 : vector<1x1x128xf32> to vector<1x128xf32>
    %8 = arith.index_cast %4 : i32 to index
    %c0_3 = arith.constant 0 : index
    %c0_4 = arith.constant 0 : index
    %9 = vector.load %arg6[%8, %c0_3, %c0_4] : memref<2x1x128xf32, #tpu.memory_space<vmem>>, vector<1x1x128xf32>
    %10 = vector.shape_cast %9 : vector<1x1x128xf32> to vector<1x128xf32>
    %c0_5 = arith.constant 0 : index
    %c0_6 = arith.constant 0 : index
    %11 = vector.load %arg4[%c0_5, %c0_6] : memref<128x128xi8, #tpu.memory_space<vmem>>, vector<128x128xi8>
    %12 = arith.extui %11 : vector<128x128xi8> to vector<128x128xi32>
    %c15_i32 = arith.constant 15 : i32
    %13 = vector.broadcast %c15_i32 : i32 to vector<128x128xi32>
    %14 = arith.andi %12, %13 : vector<128x128xi32>
    %c0_7 = arith.constant 0 : index
    %c0_8 = arith.constant 0 : index
    %15 = vector.load %arg3[%c0_7, %c0_8] : memref<16x256xf32, #tpu.memory_space<vmem>>, vector<16x128xf32>
    %16 = arith.truncf %15 : vector<16x128xf32> to vector<16x128xbf16>
    %17 = arith.sitofp %14 : vector<128x128xi32> to vector<128x128xbf16>
    %cst = arith.constant dense<0.000000e+00> : vector<16x128xf32>
    %18 = tpu.matmul %16, %17, %cst {dimension_numbers = #tpu.dot_dimension_numbers<[1], [0], [0], [1], [0, 0, 1, 1], [], []>} : vector<16x128xbf16>, vector<128x128xbf16>, vector<16x128xf32> -> vector<16x128xf32>
    %cst_9 = arith.constant dense<0.000000e+00> : vector<16xf32>
    %19 = vector.multi_reduction <add>, %15, %cst_9 [1] : vector<16x128xf32> to vector<16xf32>
    %20 = vector.shape_cast %19 : vector<16xf32> to vector<16x1xf32>
    %c0_10 = arith.constant 0 : index
    %c0_11 = arith.constant 0 : index
    %21 = vector.load %arg9[%c0_10, %c0_11] : memref<16x128xf32, #tpu.memory_space<vmem>>, vector<16x128xf32>
    %22 = vector.broadcast %7 : vector<1x128xf32> to vector<16x128xf32>
    %23 = arith.mulf %18, %22 : vector<16x128xf32>
    %24 = vector.broadcast %20 : vector<16x1xf32> to vector<16x128xf32>
    %25 = vector.broadcast %10 : vector<1x128xf32> to vector<16x128xf32>
    %26 = arith.mulf %24, %25 : vector<16x128xf32>
    %27 = arith.subf %23, %26 : vector<16x128xf32>
    %28 = arith.addf %21, %27 : vector<16x128xf32>
    %c0_12 = arith.constant 0 : index
    %c0_13 = arith.constant 0 : index
    %29 = vector.load %arg9[%c0_12, %c0_13] : memref<16x128xf32, #tpu.memory_space<vmem>>, vector<16x128xf32>
    tpu.vector_store %arg9[%c0_12, %c0_13], %28 {strides = array<i32>} : memref<16x128xf32, #tpu.memory_space<vmem>>, vector<16x128xf32>,
    %c2_i32_14 = arith.constant 2 : i32
    %30 = arith.muli %arg2, %c2_i32_14 : i32
    %c1_i32 = arith.constant 1 : i32
    %31 = arith.addi %30, %c1_i32 : i32
    %32 = arith.index_cast %31 : i32 to index
    %c0_15 = arith.constant 0 : index
    %c0_16 = arith.constant 0 : index
    %33 = vector.load %arg5[%32, %c0_15, %c0_16] : memref<2x1x128xf32, #tpu.memory_space<vmem>>, vector<1x1x128xf32>
    %34 = vector.shape_cast %33 : vector<1x1x128xf32> to vector<1x128xf32>
    %35 = arith.index_cast %31 : i32 to index
    %c0_17 = arith.constant 0 : index
    %c0_18 = arith.constant 0 : index
    %36 = vector.load %arg6[%35, %c0_17, %c0_18] : memref<2x1x128xf32, #tpu.memory_space<vmem>>, vector<1x1x128xf32>
    %37 = vector.shape_cast %36 : vector<1x1x128xf32> to vector<1x128xf32>
    %c0_19 = arith.constant 0 : index
    %c0_20 = arith.constant 0 : index
    %38 = vector.load %arg4[%c0_19, %c0_20] : memref<128x128xi8, #tpu.memory_space<vmem>>, vector<128x128xi8>
    %39 = arith.extui %38 : vector<128x128xi8> to vector<128x128xi32>
    %c4_i32 = arith.constant 4 : i32
    %40 = vector.broadcast %c4_i32 : i32 to vector<128x128xi32>
    %41 = arith.shrsi %39, %40 : vector<128x128xi32>
    %c15_i32_21 = arith.constant 15 : i32
    %42 = vector.broadcast %c15_i32_21 : i32 to vector<128x128xi32>
    %43 = arith.andi %41, %42 : vector<128x128xi32>
    %c0_22 = arith.constant 0 : index
    %c128 = arith.constant 128 : index
    %44 = vector.load %arg3[%c0_22, %c128] : memref<16x256xf32, #tpu.memory_space<vmem>>, vector<16x128xf32>
    %45 = arith.truncf %44 : vector<16x128xf32> to vector<16x128xbf16>
    %46 = arith.sitofp %43 : vector<128x128xi32> to vector<128x128xbf16>
    %cst_23 = arith.constant dense<0.000000e+00> : vector<16x128xf32>
    %47 = tpu.matmul %45, %46, %cst_23 {dimension_numbers = #tpu.dot_dimension_numbers<[1], [0], [0], [1], [0, 0, 1, 1], [], []>} : vector<16x128xbf16>, vector<128x128xbf16>, vector<16x128xf32> -> vector<16x128xf32>
    %cst_24 = arith.constant dense<0.000000e+00> : vector<16xf32>
    %48 = vector.multi_reduction <add>, %44, %cst_24 [1] : vector<16x128xf32> to vector<16xf32>
    %49 = vector.shape_cast %48 : vector<16xf32> to vector<16x1xf32>
    %c0_25 = arith.constant 0 : index
    %c0_26 = arith.constant 0 : index
    %50 = vector.load %arg9[%c0_25, %c0_26] : memref<16x128xf32, #tpu.memory_space<vmem>>, vector<16x128xf32>
    %51 = vector.broadcast %34 : vector<1x128xf32> to vector<16x128xf32>
    %52 = arith.mulf %47, %51 : vector<16x128xf32>
    %53 = vector.broadcast %49 : vector<16x1xf32> to vector<16x128xf32>
    %54 = vector.broadcast %37 : vector<1x128xf32> to vector<16x128xf32>
    %55 = arith.mulf %53, %54 : vector<16x128xf32>
    %56 = arith.subf %52, %55 : vector<16x128xf32>
    %57 = arith.addf %50, %56 : vector<16x128xf32>
    %c0_27 = arith.constant 0 : index
    %c0_28 = arith.constant 0 : index
    %58 = vector.load %arg9[%c0_27, %c0_28] : memref<16x128xf32, #tpu.memory_space<vmem>>, vector<16x128xf32>
    tpu.vector_store %arg9[%c0_27, %c0_28], %57 {strides = array<i32>} : memref<16x128xf32, #tpu.memory_space<vmem>>, vector<16x128xf32>,
    %c0_i32_29 = arith.constant 0 : i32
    %59 = arith.cmpi eq, %arg2, %c0_i32_29 : i32
    %60 = arith.extui %59 : i1 to i32
    %c0_i32_30 = arith.constant 0 : i32
    %61 = arith.cmpi ne, %60, %c0_i32_30 : i32
    scf.if %61 {
      %c0_31 = arith.constant 0 : index
      %c0_32 = arith.constant 0 : index
      %62 = vector.load %arg9[%c0_31, %c0_32] : memref<16x128xf32, #tpu.memory_space<vmem>>, vector<16x128xf32>
      %c0_33 = arith.constant 0 : index
      %c0_34 = arith.constant 0 : index
      %63 = vector.load %arg8[%c0_33, %c0_34] : memref<16x128xf32, #tpu.memory_space<vmem>>, vector<16x128xf32>
      tpu.vector_store %arg8[%c0_33, %c0_34], %62 {strides = array<i32>} : memref<16x128xf32, #tpu.memory_space<vmem>>, vector<16x128xf32>,
    } else {
    }
    return
  }
  func.func @transform_0(%arg0: i32, %arg1: i32, %arg2: i32) -> (i32, i32) {
    %c0_i32 = arith.constant 0 : i32
    return %arg0, %arg2 : i32, i32
  }
  func.func @transform_1(%arg0: i32, %arg1: i32, %arg2: i32) -> (i32, i32) {
    %c0_i32 = arith.constant 0 : i32
    return %arg2, %arg1 : i32, i32
  }
  func.func @transform_2(%arg0: i32, %arg1: i32, %arg2: i32) -> (i32, i32, i32) {
    %c0_i32 = arith.constant 0 : i32
    %c0_i32_0 = arith.constant 0 : i32
    %c0_i32_1 = arith.constant 0 : i32
    return %c0_i32, %c0_i32_0, %arg1 : i32, i32, i32
  }
  func.func @transform_3(%arg0: i32, %arg1: i32, %arg2: i32) -> (i32, i32, i32) {
    %c0_i32 = arith.constant 0 : i32
    %c0_i32_0 = arith.constant 0 : i32
    %c0_i32_1 = arith.constant 0 : i32
    return %c0_i32, %c0_i32_0, %arg1 : i32, i32, i32
  }
  func.func @transform_4(%arg0: i32, %arg1: i32, %arg2: i32) -> (i32, i32) {
    %c0_i32 = arith.constant 0 : i32
    %c0_i32_0 = arith.constant 0 : i32
    return %c0_i32, %arg1 : i32, i32
  }
  func.func @transform_5(%arg0: i32, %arg1: i32, %arg2: i32) -> (i32, i32) {
    %c0_i32 = arith.constant 0 : i32
    return %arg0, %arg1 : i32, i32
  }
}

</mosaic_0001>

<bundles_post_ra>
// kernel: tpu_custom_call.1
= control target key start
LH: loop header
LB: loop body
LE: loop exit
PB: predicated region body
PF: predicated region fallthrough
CT: control target
= control target key end

     0   :  { %10 = vsyncpa [#allocation4], 0  ;;  %s562_s0 = inlined_call_operand.hbm [shape: f32[16,256], index: 0, kind: input, shape index: {}]   ;;  %s563_s1 = inlined_call_operand.hbm [shape: u8[128,128], index: 1, kind: input, shape index: {}]   ;;  %s564_s2 = inlined_call_operand.hbm [shape: f32[2,1,128], index: 2, kind: input, shape index: {}]   ;;  %s565_s3 = inlined_call_operand.vmem [shape: f32[2,1,128], index: 3, kind: input, shape index: {}]   ;;  %s566_s4 = inlined_call_operand.vmem [shape: f32[1,128], index: 4, kind: input, shape index: {}]   ;;  %s567_s5 = inlined_call_operand.hbm [shape: f32[16,128], index: 5, kind: output, shape index: {}]  }
   0x1   :  { %11 = vsyncpa [#allocation7], 0  ;;  %s30_s20 = sshll.u32 %s563_s1, 4  ;;  %s31_s20 = int_to_ptr.hbm [resolvable:$true] %s30_s20 }
   0x2   :  { %12 = vsyncpa [#allocation5], 0  ;;  %s480_s21 = smov [#allocation6]   ;;  %s17_s25 = sshll.u32 %s562_s0, 4  ;;  %s18_s25 = int_to_ptr.hbm [resolvable:$true] %s17_s25 }
   0x3   :  { %s32_s22 = sshll.u32 %s480_s21, 4  ;;  %s481_s26 = smov 128   ;;  %s33_s22 = int_to_ptr.vmem [resolvable:$true] %s32_s22 }
   0x4   :  { %s482_s27 = smov 8   ;;  %s483_s28 = smov [#allocation3]  }
   0x5   :  { %38 = dma.hbm_to_vmem [thread:$0]  %s31_s20, 512, %s33_s22, [#allocation7], %s481_s26, %s481_s26, %s482_s27  }
   0x6   :  { %s19_s29 = sshll.u32 %s483_s28, 4  ;;  %s484_s1 = smov 256   ;;  %s20_s29 = int_to_ptr.vmem [resolvable:$true] %s19_s29 }
   0x7   :  { %s485_s30 = smov 16   ;;  %s43_s8 = sshll.u32 %s564_s2, 4  ;;  %s44_s8 = int_to_ptr.hbm [resolvable:$true] %s43_s8 }
   0x8   :  { %25 = dma.hbm_to_vmem [thread:$0]  %s18_s25, 512, %s20_s29, [#allocation4], %s484_s1, %s484_s1, %s485_s30  }
   0x9   :  { %s486_s9 = smov [#allocation8]   ;;  %s487_s10 = smov 1  }
   0xa   :  { %s45_s0 = sshll.u32 %s486_s9, 4  ;;  %s46_s0 = int_to_ptr.vmem [resolvable:$true] %s45_s0 }
   0xb   :  { %51 = dma.hbm_to_vmem [thread:$0]  %s44_s8, 32, %s46_s0, [#allocation7], %s485_s30, %s485_s30, %s487_s10  }
   0xc   :  { %474 = dma.done.wait [#allocation4], 512  }
   0xd   :  { %475 = vsyncadd [#allocation4], 4294966784 }
   0xe   :  { %476 = dma.done.wait [#allocation7], 544  }
   0xf   :  { %477 = vsyncadd [#allocation7], 4294966752  ;;  %v86_v0 = vld [vmem:[#allocation6 + $0x18] sm:$0xff]  ;;  %v85_v1 = vld [vmem:[#allocation6 + $0x10] sm:$0xff]  ;;  %s347_s18 = sshll.u32 %s567_s5, 4  ;;  %s348_s18 = int_to_ptr.hbm [resolvable:$true] %s347_s18 }
  0x10   :  { %v101_v2 = vunpack.c.2.s8 %v86_v0  ;;  %v102_v3 = vunpack.c.3.s8 %v86_v0  ;;  %v99_v4 = vunpack.c.0.s8 %v86_v0  ;;  %v100_v5 = vunpack.c.1.s8 %v86_v0  ;;  %v531_v30 = vld [vmem:[#allocation3] sm:$0xff]  ;;  %v534_v39 = vld [vmem:[#allocation3 + $0x8] sm:$0xff] }
  0x11   :  { %v97_v6 = vunpack.c.2.s8 %v85_v1  ;;  %v98_v7 = vunpack.c.3.s8 %v85_v1  ;;  %v95_v8 = vunpack.c.0.s8 %v85_v1  ;;  %v96_v9 = vunpack.c.1.s8 %v85_v1  ;;  %176 = vadd.xlane.f32.xlu0 %v531_v30  ;;  %312 = vadd.xlane.f32.xlu1 %v534_v39  ;;  %v84_v48 = vld [vmem:[#allocation6 + $0x8] sm:$0xff]  ;;  %v537_v1 = vld [vmem:[#allocation3 + $0x10] sm:$0xff] }
  0x12   :  { %v117_v10 = vand.u32 255, %v101_v2  ;;  %v118_v11 = vand.u32 255, %v102_v3  ;;  %v115_v12 = vand.u32 255, %v99_v4  ;;  %v116_v13 = vand.u32 255, %v100_v5 }
  0x13   :  { %v113_v14 = vand.u32 255, %v97_v6  ;;  %v114_v15 = vand.u32 255, %v98_v7  ;;  %v111_v16 = vand.u32 255, %v95_v8  ;;  %v112_v17 = vand.u32 255, %v96_v9  ;;  %v83_v6 = vld [vmem:[#allocation6] sm:$0xff] }
  0x14   :  { %v133_v18 = vand.u32 15, %v117_v10  ;;  %v134_v19 = vand.u32 15, %v118_v11  ;;  %v253_v20 = vshra.s32 %v117_v10, 4  ;;  %v254_v21 = vshra.s32 %v118_v11, 4  ;;  %v540_v11 = vld [vmem:[#allocation3 + $0x18] sm:$0xff] }
  0x15   :  { %v131_v22 = vand.u32 15, %v115_v12  ;;  %v132_v23 = vand.u32 15, %v116_v13  ;;  %v251_v24 = vshra.s32 %v115_v12, 4  ;;  %v252_v25 = vshra.s32 %v116_v13, 4 }
  0x16   :  { %v152_v26 = vcvt.s32.f32 %v133_v18  ;;  %v153_v27 = vcvt.s32.f32 %v134_v19  ;;  %v269_v28 = vand.u32 15, %v253_v20  ;;  %v270_v29 = vand.u32 15, %v254_v21 }
  0x17   :  { %v150_v31 = vcvt.s32.f32 %v131_v22  ;;  %v151_v32 = vcvt.s32.f32 %v132_v23  ;;  %v267_v33 = vand.u32 15, %v251_v24  ;;  %v268_v34 = vand.u32 15, %v252_v25 }
  0x18   :  { %v161_v35 = vpack.c.bf16 %v153_v27, %v152_v26  ;;  %v288_v36 = vcvt.s32.f32 %v269_v28  ;;  %v289_v37 = vcvt.s32.f32 %v270_v29  ;;  %v129_v38 = vand.u32 15, %v113_v14 }
  0x19   :  { %v160_v40 = vpack.c.bf16 %v151_v32, %v150_v31  ;;  %v286_v41 = vcvt.s32.f32 %v267_v33  ;;  %v287_v42 = vcvt.s32.f32 %v268_v34  ;;  %v130_v43 = vand.u32 15, %v114_v15  ;;  %178 = vadd.xlane.f32.xlu0 %v537_v1  ;;  %314 = vadd.xlane.f32.xlu1 %v540_v11 }
  0x1a   :  { %162 = vmatpush.bf16.msra.mxu0 %v161_v35  ;;  %v297_v44 = vpack.c.bf16 %v289_v37, %v288_v36  ;;  %v148_v45 = vcvt.s32.f32 %v129_v38  ;;  %v249_v46 = vshra.s32 %v113_v14, 4  ;;  %v250_v47 = vshra.s32 %v114_v15, 4 }
  0x1b   :  { %v296_v49 = vpack.c.bf16 %v287_v42, %v286_v41  ;;  %v149_v50 = vcvt.s32.f32 %v130_v43  ;;  %v127_v51 = vand.u32 15, %v111_v16  ;;  %v128_v52 = vand.u32 15, %v112_v17 }
  0x1c   :  { %298 = vmatpush.bf16.msra.mxu1 %v297_v44  ;;  %v265_v53 = vand.u32 15, %v249_v46  ;;  %v266_v54 = vand.u32 15, %v250_v47  ;;  %v247_v55 = vshra.s32 %v111_v16, 4  ;;  %v248_v56 = vshra.s32 %v112_v17, 4 }
  0x1d   :  { %v159_v57 = vpack.c.bf16 %v149_v50, %v148_v45  ;;  %v146_v58 = vcvt.s32.f32 %v127_v51  ;;  %v147_v59 = vcvt.s32.f32 %v128_v52  ;;  %v93_v60 = vunpack.c.2.s8 %v84_v48 }
  0x1e   :  { %163 = vmatpush.bf16.msra.mxu0 %v160_v40  ;;  %v284_v61 = vcvt.s32.f32 %v265_v53  ;;  %v285_v62 = vcvt.s32.f32 %v266_v54  ;;  %v263_v63 = vand.u32 15, %v247_v55  ;;  %v264_v0 = vand.u32 15, %v248_v56 }
  0x1f   :  { %v158_v2 = vpack.c.bf16 %v147_v59, %v146_v58  ;;  %v94_v3 = vunpack.c.3.s8 %v84_v48  ;;  %v109_v4 = vand.u32 255, %v93_v60  ;;  %v91_v5 = vunpack.c.0.s8 %v84_v48 }
  0x20   :  { %299 = vmatpush.bf16.msra.mxu1 %v296_v49  ;;  %v295_v7 = vpack.c.bf16 %v285_v62, %v284_v61  ;;  %v282_v8 = vcvt.s32.f32 %v263_v63  ;;  %v283_v9 = vcvt.s32.f32 %v264_v0  ;;  %v92_v10 = vunpack.c.1.s8 %v84_v48 }
  0x21   :  { %v110_v12 = vand.u32 255, %v94_v3  ;;  %v125_v13 = vand.u32 15, %v109_v4  ;;  %v245_v14 = vshra.s32 %v109_v4, 4  ;;  %v107_v15 = vand.u32 255, %v91_v5 }
  0x22   :  { %164 = vmatpush.bf16.msra.mxu0 %v159_v57  ;;  %v294_v16 = vpack.c.bf16 %v283_v9, %v282_v8  ;;  %v108_v17 = vand.u32 255, %v92_v10  ;;  %v89_v18 = vunpack.c.2.s8 %v83_v6  ;;  %v90_v19 = vunpack.c.3.s8 %v83_v6 }
  0x23   :  { %v126_v20 = vand.u32 15, %v110_v12  ;;  %v144_v21 = vcvt.s32.f32 %v125_v13  ;;  %v246_v22 = vshra.s32 %v110_v12, 4  ;;  %v261_v23 = vand.u32 15, %v245_v14 }
  0x24   :  { %300 = vmatpush.bf16.msra.mxu1 %v295_v7  ;;  %v123_v24 = vand.u32 15, %v107_v15  ;;  %v124_v25 = vand.u32 15, %v108_v17  ;;  %v243_v26 = vshra.s32 %v107_v15, 4  ;;  %v244_v27 = vshra.s32 %v108_v17, 4  ;;  %v373_v15 = vld [vmem:[%s565_s3] ss:$0 sm:$0xff] }
  0x25   :  { %v145_v28 = vcvt.s32.f32 %v126_v20  ;;  %v262_v29 = vand.u32 15, %v246_v22  ;;  %v280_v31 = vcvt.s32.f32 %v261_v23  ;;  %v105_v32 = vand.u32 255, %v89_v18  ;;  %v375_v17 = vld [vmem:[#allocation8] ss:$0 sm:$0xff]  ;;  %v376_v18 = vld [vmem:[%s565_s3 + $0x1] ss:$0 sm:$0xff] }
  0x26   :  { %165 = vmatpush.bf16.msra.mxu0 %v158_v2  ;;  %v142_v33 = vcvt.s32.f32 %v123_v24  ;;  %v143_v34 = vcvt.s32.f32 %v124_v25  ;;  %v259_v35 = vand.u32 15, %v243_v26  ;;  %v260_v36 = vand.u32 15, %v244_v27  ;;  %s488_s3 = smov [#allocation9]  }
  0x27   :  { %v157_v37 = vpack.c.bf16 %v145_v28, %v144_v21  ;;  %v281_v38 = vcvt.s32.f32 %v262_v29  ;;  %v106_v40 = vand.u32 255, %v90_v19  ;;  %v121_v41 = vand.u32 15, %v105_v32 }
  0x28   :  { %301 = vmatpush.bf16.msra.mxu1 %v294_v16  ;;  %v278_v42 = vcvt.s32.f32 %v259_v35  ;;  %v279_v43 = vcvt.s32.f32 %v260_v36  ;;  %v241_v44 = vshra.s32 %v105_v32, 4  ;;  %v156_v49 = vpack.c.bf16 %v143_v34, %v142_v33 }
  0x29   :  { %v293_v45 = vpack.c.bf16 %v281_v38, %v280_v31  ;;  %v122_v46 = vand.u32 15, %v106_v40  ;;  %v140_v47 = vcvt.s32.f32 %v121_v41  ;;  %v242_v48 = vshra.s32 %v106_v40, 4 }
  0x2a   :  { %166 = vmatpush.bf16.msra.mxu0 %v157_v37  ;;  %v257_v50 = vand.u32 15, %v241_v44  ;;  %v87_v51 = vunpack.c.0.s8 %v83_v6  ;;  %v88_v52 = vunpack.c.1.s8 %v83_v6  ;;  %v292_v55 = vpack.c.bf16 %v279_v43, %v278_v42 }
  0x2b   :  { %v141_v53 = vcvt.s32.f32 %v122_v46  ;;  %v258_v54 = vand.u32 15, %v242_v48  ;;  %v137_v12 = vpack.c.bf16 %v537_v1, %v531_v30  ;;  %v273_v13 = vpack.c.bf16 %v540_v11, %v534_v39  ;;  %v377_v30 = vld [vmem:[#allocation8 + $0x1] ss:$0 sm:$0xff]  ;;  %v374_v39 = vld [vmem:[%s566_s4] ss:$0 sm:$0xff]  ;;  %s345_s4 = sshll.u32 %s488_s3, 4  ;;  %s346_s4 = int_to_ptr.vmem [resolvable:$true] %s345_s4 }
  0x2c   :  { %302 = vmatpush.bf16.msra.mxu1 %v293_v45  ;;  %v276_v56 = vcvt.s32.f32 %v257_v50  ;;  %v103_v57 = vand.u32 255, %v87_v51  ;;  %v104_v58 = vand.u32 255, %v88_v52 }
  0x2d   :  { %v155_v59 = vpack.c.bf16 %v141_v53, %v140_v47  ;;  %v277_v60 = vcvt.s32.f32 %v258_v54 }
  0x2e   :  { %167 = vmatpush.bf16.msra.mxu0 %v156_v49  ;;  %v119_v61 = vand.u32 15, %v103_v57  ;;  %v120_v62 = vand.u32 15, %v104_v58  ;;  %v239_v63 = vshra.s32 %v103_v57, 4  ;;  %v240_v0 = vshra.s32 %v104_v58, 4 }
  0x2f   :  { %v291_v2 = vpack.c.bf16 %v277_v60, %v276_v56 }
  0x30   :  { %303 = vmatpush.bf16.msra.mxu1 %v292_v55  ;;  %v138_v3 = vcvt.s32.f32 %v119_v61  ;;  %v139_v4 = vcvt.s32.f32 %v120_v62  ;;  %v255_v5 = vand.u32 15, %v239_v63  ;;  %v256_v6 = vand.u32 15, %v240_v0 }
  0x32   :  { %168 = vmatpush.bf16.msra.mxu0 %v155_v59  ;;  %v154_v7 = vpack.c.bf16 %v139_v4, %v138_v3  ;;  %v274_v8 = vcvt.s32.f32 %v255_v5  ;;  %v275_v9 = vcvt.s32.f32 %v256_v6 }
  0x34   :  { %304 = vmatpush.bf16.msra.mxu1 %v291_v2  ;;  %v290_v10 = vpack.c.bf16 %v275_v9, %v274_v8 }
  0x36   :  { %169 = vmatpush.bf16.msra.mxu0 %v154_v7 }
  0x38   :  { %305 = vmatpush.bf16.msra.mxu1 %v290_v10 }
  0x39   :  { %170 = vmatmul.bf16.vlgmr.msra.gmra.mxu0 %v137_v12 }
  0x3b   :  { %306 = vmatmul.bf16.vlgmr.msra.gmra.mxu1 %v273_v13 }
  0x84   :  { %v177_v14 = vpop.xlane.xlu0 %176  ;;  %v313_v16 = vpop.xlane.xlu1 %312 }
  0x85   :  { %v190_v19 = vmul.f32 %v373_v15, %v177_v14  ;;  %v326_v20 = vmul.f32 %v376_v18, %v313_v16 }
  0x8c   :  { %v179_v24 = vpop.xlane.xlu0 %178  ;;  %v315_v27 = vpop.xlane.xlu1 %314 }
  0x8d   :  { %v191_v29 = vmul.f32 %v373_v15, %v179_v24  ;;  %v327_v33 = vmul.f32 %v376_v18, %v315_v27 }
  0xb6   :  { %v171_v1 = vpop.f32.mrf.mxu0 }
  0xb7   :  { %v185_v11 = vmul.f32 %v375_v17, %v171_v1 }
  0xb8   :  { %v307_v21 = vpop.f32.mrf.mxu1 }
  0xb9   :  { %v192_v22 = vsub.f32 %v185_v11, %v190_v19  ;;  %v321_v23 = vmul.f32 %v377_v30, %v307_v21 }
  0xbb   :  { %v194_v25 = vadd.f32 %v374_v39, %v192_v22  ;;  %v328_v26 = vsub.f32 %v321_v23, %v326_v20 }
  0xbd   :  { %v330_v28 = vadd.f32 %v328_v26, %v194_v25 }
  0xbe   :  { %v173_v31 = vpop.f32.mrf.mxu0 }
  0xbf   :  { %339 = vst [vmem:[#allocation9] sm:$0xff] %v330_v28  ;;  %v186_v32 = vmul.f32 %v375_v17, %v173_v31 }
  0xc0   :  { %v309_v34 = vpop.f32.mrf.mxu1 }
  0xc1   :  { %v193_v35 = vsub.f32 %v186_v32, %v191_v29  ;;  %v322_v36 = vmul.f32 %v377_v30, %v309_v34 }
  0xc3   :  { %v195_v37 = vadd.f32 %v374_v39, %v193_v35  ;;  %v329_v38 = vsub.f32 %v322_v36, %v327_v33 }
  0xc5   :  { %v331_v40 = vadd.f32 %v329_v38, %v195_v37 }
  0xc7   :  { %340 = vst [vmem:[#allocation9 + $0x8] sm:$0xff] %v331_v40 }
  0xc8   :  { %353 = dma.vmem_to_hbm [thread:$0]  %s346_s4, 256, %s348_s18, [#allocation5], %s481_s26, %s481_s26, %s482_s27  }
  0xc9   :  { %478 = dma.done.wait [#allocation5], 256  }
  0xca   :  { %479 = vsyncadd [#allocation5], 4294967040 }
  0xcb   :  { %358 = vsyncpa [#allocation4], 1 }
  0xcc   :  { %359 = vsyncpa [#allocation7], 1 }
  0xcd   :  { %360 = vsyncpa [#allocation5], 1 }

</bundles_post_ra>
